<compile_context>
chip_gen: v7x
topology: tpu7x:2x2x1
jax: 0.10.0
libtpu: 0.0.40
codegen_flags: <defaults>
</compile_context>

<pallas_src>
import functools

import jax
import jax.numpy as jnp
from jax.experimental import pallas as pl
from jax.experimental.pallas import tpu as pltpu

_LANE = 128
_MAX_SIZE_TILE = 1024  # lane-dense feature-tile cap (multiple of 128)


def _cdiv(a, b):
    return -(-a // b)


def _round_up(x, m):
    return ((x + m - 1) // m) * m


@functools.lru_cache(maxsize=None)
def _tpu_config():
    """Returns (max_tile_elems, vmem_limit_bytes, prefer_multi_step)."""
    try:
        vmem_cap = int(pltpu.get_tpu_info().vmem_capacity_bytes)
    except Exception:
        vmem_cap = 64 * 1024 * 1024  # conservative (v7x-like) fallback
    if vmem_cap <= 96 * 1024 * 1024:
        # v7x-class: 64 MiB VMEM per TensorCore, 2 TCs/chip.
        #   512K-elem tiles -> ~12 MiB of double-buffered f32 I/O + a few MiB
        #   of full-tile f32 temporaries, comfortably under the 40 MiB limit.
        return 512 * 1024, 40 * 1024 * 1024, True
    # v5e / v6e: 128 MiB VMEM, single TensorCore.
    return 2 * 1024 * 1024, 96 * 1024 * 1024, False


def g_gauss_kernel(params_ref, z_c_ref, u_ref, out_ref):
    # Compute in f32 regardless of I/O dtype (matches the f32 PyTorch ref;
    # also correct on v5e which has no bf16 VPU/EUP).
    a = params_ref[...].astype(jnp.float32)      # (10, St)
    u = u_ref[...].astype(jnp.float32)           # (Bt, St)
    z_c = z_c_ref[...].astype(jnp.float32)       # (Bt, St)

    # (1, St) parameter rows broadcast over the batch tile.  The VALU/EUP work
    # is free filler under the DMA stall (kernel is HBM-bandwidth bound).
    mu = a[0:1] * jax.nn.sigmoid(a[1:2] * u + a[2:3]) + a[3:4] * u + a[4:5]
    v = a[5:6] * jax.nn.sigmoid(a[6:7] * u + a[7:8]) + a[8:9] * u + a[9:10]

    out_ref[...] = ((z_c - mu) * v + mu).astype(out_ref.dtype)


def _choose_tiles(batch, size, itemsize, max_tile_elems, prefer_multi_step):
    """Pick lane-dense, VMEM-budgeted 2-D tiles (no padded shapes needed)."""
    # dtype-aware sublane alignment for packed layouts (f32:8, bf16:16, 8-bit:32)
    sublane = {4: 8, 2: 16, 1: 32}.get(int(itemsize), 8)

    # Feature tile: multiple of 128, capped.
    size_tile = min(_round_up(size, _LANE), _MAX_SIZE_TILE)
    n_size_blocks = _cdiv(size, size_tile)

    # Batch tile: grow to the full per-buffer element budget (no fixed cap).
    batch_r = _round_up(batch, sublane)
    bt_cap = max(sublane, (max_tile_elems // size_tile) // sublane * sublane)
    batch_tile = min(bt_cap, batch_r)
    n_batch_blocks = _cdiv(batch, batch_tile)

    # On multi-TC chips (v7x) make sure each core gets >=2 grid steps (DMA /
    # compute overlap) when the batch allows.  On single-TC chips a forced
    # split is just extra per-step overhead, so skip it.
    if prefer_multi_step and n_size_blocks * n_batch_blocks < 4:
        want_batch_blocks = _cdiv(4, n_size_blocks)
        max_batch_blocks = max(1, batch_r // sublane)
        target = min(want_batch_blocks, max_batch_blocks)
        if target > n_batch_blocks:
            batch_tile = _round_up(_cdiv(batch_r, target), sublane)
            n_batch_blocks = _cdiv(batch, batch_tile)

    return batch_tile, size_tile, n_batch_blocks, n_size_blocks


@jax.jit
def g_gauss(params, z_c, u):
    """params: (10, size); z_c, u: (batch, size). Returns z_est (batch, size)."""
    batch, size = z_c.shape
    assert u.shape == (batch, size)
    assert params.shape == (10, size)

    max_tile_elems, vmem_limit, prefer_multi_step = _tpu_config()
    batch_tile, size_tile, n_batch_blocks, n_size_blocks = _choose_tiles(
        batch, size, jnp.dtype(z_c.dtype).itemsize, max_tile_elems,
        prefer_multi_step)

    # Pad only the tiny (10, size) params so every params block is
    # deterministic.  The big activations are NOT padded: Pallas handles the
    # partial edge blocks (discarded lanes on read, clipped writes on output),
    # saving the extra HBM read+write passes a host-side pad/slice would cost.
    size_p = n_size_blocks * size_tile
    if size_p != size:
        params = jnp.pad(params, ((0, 0), (0, size_p - size)))

    # Feature blocks outer, batch blocks inner: the params block index (0, j)
    # is constant across consecutive inner steps, so its re-DMA is elided.
    grid = (n_size_blocks, n_batch_blocks)
    act_spec = pl.BlockSpec((batch_tile, size_tile), lambda j, i: (i, j))

    return pl.pallas_call(
        g_gauss_kernel,
        out_shape=jax.ShapeDtypeStruct((batch, size), z_c.dtype),
        grid_spec=pltpu.PrefetchScalarGridSpec(
            num_scalar_prefetch=0,
            grid=grid,
            in_specs=[
                pl.BlockSpec((10, size_tile), lambda j, i: (0, j)),  # params
                act_spec,   # z_c
                act_spec,   # u
            ],
            out_specs=act_spec,
        ),
        compiler_params=pltpu.CompilerParams(
            dimension_semantics=("parallel", "parallel"),
            vmem_limit_bytes=vmem_limit,
        ),
    )(params, z_c, u)


def init_g_gauss_params(size):
    """Deterministic init, identical to the PyTorch module's __init__."""
    init_values = [0.0, 1.0, 0.0, 0.0, 0.0, 0.0, 1.0, 0.0, 0.0, 0.0]
    rows = [jnp.full((size,), v, dtype=jnp.float32) for v in init_values]
    return jnp.stack(rows, axis=0)  # (10, size)


def g_gauss_ref(params, z_c, u):
    """Pure-JAX reference for correctness checking."""
    a = [params[i] for i in range(10)]
    mu = a[0] * jax.nn.sigmoid(a[1] * u + a[2]) + a[3] * u + a[4]
    v = a[5] * jax.nn.sigmoid(a[6] * u + a[7]) + a[8] * u + a[9]
    return (z_c - mu) * v + mu


if __name__ == "__main__":
    key = jax.random.PRNGKey(0)
    k1, k2, k3, k4, k5, k6, k7 = jax.random.split(key, 7)

    # Case 1: lane-aligned f32 shapes, PyTorch default init.
    batch, size = 16, 128
    z_c = jax.random.normal(k1, (batch, size), dtype=jnp.float32)
    u = jax.random.normal(k2, (batch, size), dtype=jnp.float32)
    params = init_g_gauss_params(size)

    out = g_gauss(params, z_c, u)
    jax.block_until_ready(out)
    ref = g_gauss_ref(params, z_c, u)
    assert out.shape == (batch, size)
    assert jnp.allclose(out, ref, atol=1e-5, rtol=1e-5)

    # Case 2: non-aligned shapes + random params (exercises the partial
    # edge-block path: no host padding of activations, no output slice).
    batch2, size2 = 13, 100
    z_c2 = jax.random.normal(k3, (batch2, size2), dtype=jnp.float32)
    u2 = jax.random.normal(k4, (batch2, size2), dtype=jnp.float32)
    params2 = 0.5 * jax.random.normal(k5, (10, size2), dtype=jnp.float32)

    out2 = g_gauss(params2, z_c2, u2)
    jax.block_until_ready(out2)
    ref2 = g_gauss_ref(params2, z_c2, u2)
    assert out2.shape == (batch2, size2)
    assert jnp.allclose(out2, ref2, atol=1e-5, rtol=1e-5)

    # Case 3: bf16 activations (halves HBM traffic; math still f32 in-kernel).
    batch3, size3 = 32, 256
    z_c3 = jax.random.normal(k6, (batch3, size3), jnp.float32).astype(jnp.bfloat16)
    u3 = jax.random.normal(k7, (batch3, size3), jnp.float32).astype(jnp.bfloat16)
    params3 = 0.5 * jax.random.normal(k5, (10, size3), dtype=jnp.float32)

    out3 = g_gauss(params3, z_c3, u3)
    jax.block_until_ready(out3)
    ref3 = g_gauss_ref(params3, z_c3.astype(jnp.float32), u3.astype(jnp.float32))
    assert out3.shape == (batch3, size3)
    assert out3.dtype == jnp.bfloat16
    assert jnp.allclose(out3.astype(jnp.float32), ref3, atol=2e-2, rtol=2e-2)

    print("KERNEL_OK")
</pallas_src>

<mosaic_0001>
module attributes {stable_mosaic.version = 11 : i64} {
  func.func @g_gauss_kernel(%arg0: i32, %arg1: i32, %arg2: memref<10x128xf32, #tpu.memory_space<vmem>>, %arg3: memref<8x128xf32, #tpu.memory_space<vmem>>, %arg4: memref<8x128xf32, #tpu.memory_space<vmem>>, %arg5: memref<8x128xf32, #tpu.memory_space<vmem>>) attributes {dimension_semantics = [#tpu.dimension_semantics<parallel>, #tpu.dimension_semantics<parallel>], iteration_bounds = array<i64: 1, 2>, scalar_prefetch = 0 : i64, scratch_operands = 0 : i64, tpu.core_type = #tpu.core_type<tc>, window_params = [{transform_indices = @transform_0, window_bounds = array<i64: 10, 128>}, {transform_indices = @transform_1, window_bounds = array<i64: 8, 128>}, {transform_indices = @transform_2, window_bounds = array<i64: 8, 128>}, {transform_indices = @transform_3, window_bounds = array<i64: 8, 128>}]} {
    %c0 = arith.constant 0 : index
    %c0_0 = arith.constant 0 : index
    %0 = vector.load %arg2[%c0, %c0_0] : memref<10x128xf32, #tpu.memory_space<vmem>>, vector<10x128xf32>
    %c0_1 = arith.constant 0 : index
    %c0_2 = arith.constant 0 : index
    %1 = vector.load %arg4[%c0_1, %c0_2] : memref<8x128xf32, #tpu.memory_space<vmem>>, vector<8x128xf32>
    %c0_3 = arith.constant 0 : index
    %c0_4 = arith.constant 0 : index
    %2 = vector.load %arg3[%c0_3, %c0_4] : memref<8x128xf32, #tpu.memory_space<vmem>>, vector<8x128xf32>
    %3 = vector.extract_strided_slice %0 {offsets = [0, 0], sizes = [1, 128], strides = [1, 1]} : vector<10x128xf32> to vector<1x128xf32>
    %4 = vector.extract_strided_slice %0 {offsets = [1, 0], sizes = [1, 128], strides = [1, 1]} : vector<10x128xf32> to vector<1x128xf32>
    %5 = vector.broadcast %4 : vector<1x128xf32> to vector<8x128xf32>
    %6 = arith.mulf %5, %1 : vector<8x128xf32>
    %7 = vector.extract_strided_slice %0 {offsets = [2, 0], sizes = [1, 128], strides = [1, 1]} : vector<10x128xf32> to vector<1x128xf32>
    %8 = vector.broadcast %7 : vector<1x128xf32> to vector<8x128xf32>
    %9 = arith.addf %6, %8 : vector<8x128xf32>
    %10 = arith.negf %9 : vector<8x128xf32>
    %11 = math.exp %10 : vector<8x128xf32>
    %cst = arith.constant 1.000000e+00 : f32
    %12 = vector.broadcast %cst : f32 to vector<8x128xf32>
    %13 = arith.addf %12, %11 : vector<8x128xf32>
    %14 = arith.divf %12, %13 : vector<8x128xf32>
    %15 = vector.broadcast %3 : vector<1x128xf32> to vector<8x128xf32>
    %16 = arith.mulf %15, %14 : vector<8x128xf32>
    %17 = vector.extract_strided_slice %0 {offsets = [3, 0], sizes = [1, 128], strides = [1, 1]} : vector<10x128xf32> to vector<1x128xf32>
    %18 = vector.broadcast %17 : vector<1x128xf32> to vector<8x128xf32>
    %19 = arith.mulf %18, %1 : vector<8x128xf32>
    %20 = arith.addf %16, %19 : vector<8x128xf32>
    %21 = vector.extract_strided_slice %0 {offsets = [4, 0], sizes = [1, 128], strides = [1, 1]} : vector<10x128xf32> to vector<1x128xf32>
    %22 = vector.broadcast %21 : vector<1x128xf32> to vector<8x128xf32>
    %23 = arith.addf %20, %22 : vector<8x128xf32>
    %24 = vector.extract_strided_slice %0 {offsets = [5, 0], sizes = [1, 128], strides = [1, 1]} : vector<10x128xf32> to vector<1x128xf32>
    %25 = vector.extract_strided_slice %0 {offsets = [6, 0], sizes = [1, 128], strides = [1, 1]} : vector<10x128xf32> to vector<1x128xf32>
    %26 = vector.broadcast %25 : vector<1x128xf32> to vector<8x128xf32>
    %27 = arith.mulf %26, %1 : vector<8x128xf32>
    %28 = vector.extract_strided_slice %0 {offsets = [7, 0], sizes = [1, 128], strides = [1, 1]} : vector<10x128xf32> to vector<1x128xf32>
    %29 = vector.broadcast %28 : vector<1x128xf32> to vector<8x128xf32>
    %30 = arith.addf %27, %29 : vector<8x128xf32>
    %31 = arith.negf %30 : vector<8x128xf32>
    %32 = math.exp %31 : vector<8x128xf32>
    %cst_5 = arith.constant 1.000000e+00 : f32
    %33 = vector.broadcast %cst_5 : f32 to vector<8x128xf32>
    %34 = arith.addf %33, %32 : vector<8x128xf32>
    %35 = arith.divf %33, %34 : vector<8x128xf32>
    %36 = vector.broadcast %24 : vector<1x128xf32> to vector<8x128xf32>
    %37 = arith.mulf %36, %35 : vector<8x128xf32>
    %38 = vector.extract_strided_slice %0 {offsets = [8, 0], sizes = [1, 128], strides = [1, 1]} : vector<10x128xf32> to vector<1x128xf32>
    %39 = vector.broadcast %38 : vector<1x128xf32> to vector<8x128xf32>
    %40 = arith.mulf %39, %1 : vector<8x128xf32>
    %41 = arith.addf %37, %40 : vector<8x128xf32>
    %42 = vector.extract_strided_slice %0 {offsets = [9, 0], sizes = [1, 128], strides = [1, 1]} : vector<10x128xf32> to vector<1x128xf32>
    %43 = vector.broadcast %42 : vector<1x128xf32> to vector<8x128xf32>
    %44 = arith.addf %41, %43 : vector<8x128xf32>
    %45 = arith.subf %2, %23 : vector<8x128xf32>
    %46 = arith.mulf %45, %44 : vector<8x128xf32>
    %47 = arith.addf %46, %23 : vector<8x128xf32>
    %c0_6 = arith.constant 0 : index
    %c0_7 = arith.constant 0 : index
    %48 = vector.load %arg5[%c0_6, %c0_7] : memref<8x128xf32, #tpu.memory_space<vmem>>, vector<8x128xf32>
    tpu.vector_store %arg5[%c0_6, %c0_7], %47 {strides = array<i32>} : memref<8x128xf32, #tpu.memory_space<vmem>>, vector<8x128xf32>,
    return
  }
  func.func @transform_0(%arg0: i32, %arg1: i32) -> (i32, i32) {
    %c0_i32 = arith.constant 0 : i32
    %c0_i32_0 = arith.constant 0 : i32
    return %c0_i32, %arg0 : i32, i32
  }
  func.func @transform_1(%arg0: i32, %arg1: i32) -> (i32, i32) {
    %c0_i32 = arith.constant 0 : i32
    return %arg1, %arg0 : i32, i32
  }
  func.func @transform_2(%arg0: i32, %arg1: i32) -> (i32, i32) {
    %c0_i32 = arith.constant 0 : i32
    return %arg1, %arg0 : i32, i32
  }
  func.func @transform_3(%arg0: i32, %arg1: i32) -> (i32, i32) {
    %c0_i32 = arith.constant 0 : i32
    return %arg1, %arg0 : i32, i32
  }
}

</mosaic_0001>

<bundles_post_ra>
// kernel: g_gauss.1
= control target key start
LH: loop header
LB: loop body
LE: loop exit
PB: predicated region body
PF: predicated region fallthrough
CT: control target
= control target key end

     0   :  { %s1033_s0 = inlined_call_operand.hbm [shape: f32[10,128], index: 0, kind: input, shape index: {}]   ;;  %s1034_s1 = inlined_call_operand.hbm [shape: f32[16,128], index: 1, kind: input, shape index: {}]   ;;  %s1035_s2 = inlined_call_operand.hbm [shape: f32[16,128], index: 2, kind: input, shape index: {}]   ;;  %s1036_s3 = inlined_call_operand.hbm [shape: f32[16,128], index: 3, kind: output, shape index: {}]  }
   0x1   :  { %1042 = sst [smem:[#allocation12_spill]] %s1034_s1 }
   0x2   :  { %8 = vsyncpa [#allocation3], 0 }
   0x3   :  { %9 = vsyncpa [#allocation6], 0 }
   0x4   :  { %11 = vsyncpa [#allocation6 + $0x1], 0 }
   0x5   :  { %12 = vsyncpa [#allocation4], 0 }
   0x6   :  { %14 = vsyncpa [#allocation4 + $0x1], 0  ;;  %s774_s12 = smov 0   ;;  %s776_s13 = smov 0  }
   0x7   :  { %s778_s14 = smov 0   ;;  %s780_s15 = smov 0  }
   0x8   :  { %s782_s16 = smov 0   ;;  %s784_s17 = smov 0  }
   0x9 LB: > { %s29_s18 = sadd.s32 1, %s742_s16  ;;  %s67_s19 = sadd.s32 1, %s734_s14  ;;  %s746_s17 = sphi %s784_s17, %s20_s17   ;;  %s742_s16 = sphi %s782_s16, %s1062_s16   ;;  %s738_s15 = sphi %s780_s15, %s1061_s15   ;;  %s734_s14 = sphi %s778_s14, %s1060_s14   ;;  %s730_s13 = sphi %s776_s13, %s1059_s13   ;;  %s726_s12 = sphi %s774_s12, %s1058_s12  }
   0xa   : > { %p30_p0 = scmp.ge.s32.totalorder %s29_s18, 2  ;;  %p74_p1 = scmp.ne.s32.totalorder %s734_s14, %s730_s13 }
   0xb   : > { %p75_p2 = scmp.eq.s32.totalorder %s746_s17, 0  ;;  %p510_p5 = scmp.lt.s32.totalorder %s746_s17, 2 }
   0xc   : > { %s1064_s18 = smov (%p30_p0, %s29_s18), 0  ;;  %s175_s21 = sand.u32 1, %s746_s17  }
   0xd   : > { %p76_p4 = por %p75_p2, %p74_p1  ;;  %s62_s20 = ssub.s32 %s742_s16, %s1064_s18 }
   0xe   : > { %p65_p6 = scmp.eq.s32.totalorder %s62_s20, 0  ;;  %s177_s22 = sand.u32 1, %s734_s14  }
   0xf   : > { %s470_s23 = sshll.u32 %s742_s16, 7  ;;  %s824_s25 = sshll.u32 %s177_s22, 3 }
  0x10   : > { %s822_s24 = scalar_select %p65_p6, %s734_s14, %s67_s19  }
  0x11   : > { %s1043_s1 = sld [smem:[#allocation12_spill]]  ;;  %p833_p7 = pnand %p510_p5, %p76_p4 }
  0x12   : > { %s179_s30 = scalar_lea.vmem [#allocation5], %s824_s25  ;;  %s840_s5 = scalar_lea.sflag [#allocation6], %s175_s21 }
  0x13   : > { %s187_s4 = sshll.u32 %s179_s30, 4  ;;  %p574_p9 = pneg %p833_p7  ;;  %s838_s4 = int_to_ptr.vmem [resolvable:$true] %s187_s4 }
  0x17   : > { %s831_s28 = scalar_lea.hbm %s1043_s1, %s470_s23  ;;  %s577_s9 = scalar_lea.hbm %s1043_s1, 256 }
  0x18   : > { %s572_s6 = scalar_lea.hbm %s831_s28, 128  ;;  %p578_p12 = scmp.lt.u32.totalorder %s831_s28, %s1043_s1 }
  0x19   : > { %p573_p8 = scmp.ne.s32.totalorder %s831_s28, %s572_s6  ;;  %p579_p13 = scmp.lt.u32.totalorder %s577_s9, %s572_s6 }
  0x1a   : > { %p581_p2 = scmp.lt.u32.totalorder %s572_s6, %s831_s28 }
  0x1b   : > { %p575_p10 = pnand %p574_p9, %p573_p8  ;;  %p580_p0 = por %p579_p13, %p578_p12 }
  0x1d   : > { %p576_p11 = pneg %p575_p10  ;;  %p582_p4 = por %p581_p2, %p580_p0 }
  0x1f   : > { %p583_p5 = pnand %p582_p4, %p576_p11 }
  0x21   : > { %586 = shalt.err (!%p583_p5)
}
  0x22   : > { %s587_s19 = scalar_lea.vmem %s838_s4, 128  ;;  %s748_s20 = smov [#allocation5]  }
  0x23   : > { %p588_p6 = scmp.ne.s32.totalorder %s838_s4, %s587_s19  ;;  %s592_s21 = sshll.u32 %s748_s20, 4  ;;  %s593_s21 = int_to_ptr.vmem [resolvable:$false] %s592_s21 }
  0x24   : > { %s594_s22 = scalar_lea.vmem %s593_s21, 256  ;;  %p595_p3 = scmp.lt.s32.totalorder %s838_s4, %s593_s21 }
  0x25   : > { %p590_p8 = pnand %p588_p6, %p574_p9  ;;  %p596_p12 = scmp.lt.s32.totalorder %s594_s22, %s587_s19 }
  0x27   : > { %p591_p10 = pneg %p590_p8  ;;  %p597_p13 = por %p596_p12, %p595_p3 }
  0x29   : > { %p598_p0 = pnand %p597_p13, %p591_p10 }
  0x2b   : > { %601 = shalt.err (!%p598_p0)
}
  0x2c   : > { %501 = dma.hbm_to_vmem [thread:$0]  (!%p833_p7), %s831_s28, 128, %s838_s4, %s840_s5  }
  0x2d   : > { %s869_s26 = sadd.s32 4294967295, %s746_s17   ;;  %s465_s27 = sadd.s32 4294967294, %s746_s17  }
  0x2e   : > { %p80_p3 = scmp.ne.s32.totalorder %s730_s13, %s726_s12  ;;  %p1037_p11 = scmp.eq.s32.totalorder %s869_s26, 0 }
  0x2f   : > { %p134_p2 = scmp.eq.s32.totalorder %s869_s26, 1  ;;  %p140_p4 = scmp.eq.s32.totalorder %s465_s27, 1 }
  0x30   : > { %p466_p5 = scmp.ge.s32.totalorder %s746_s17, 1  ;;  %p879_p6 = por %p1037_p11, %p80_p3 }
  0x31   : > { %p886_p8 = por %p134_p2, %p74_p1  ;;  %p890_p10 = por %p140_p4, %p80_p3 }
  0x32   : > { %s1045_s30 = scalar_select %p879_p6, 1, 0 }
  0x33   : > { %s1046_s28 = scalar_select %p886_p8, 1, 0 }
  0x34   : > { %s1047_s4 = scalar_select %p890_p10, 1, 0 }
  0x35   : > { %p147_p12 = scmp.lt.s32.totalorder %s746_s17, 3  ;;  %s749_s7 = smov [#allocation2]  }
  0x36   : > { %s161_s8 = sshll.u32 %s749_s7, 4  ;;  %s904_s11 = scalar_lea.hbm %s1035_s2, %s470_s23  ;;  %s906_s8 = int_to_ptr.vmem [resolvable:$true] %s161_s8 }
  0x37   : > { %p895_p13 = pnand %p466_p5, %p147_p12  ;;  %s198_s19 = scalar_lea.vmem [#allocation7], %s824_s25 }
  0x38   : > { %s206_s20 = sshll.u32 %s198_s19, 4  ;;  %s602_s22 = scalar_lea.hbm %s904_s11, 128  ;;  %s207_s20 = int_to_ptr.vmem [resolvable:$true] %s206_s20 }
  0x39   : > { %s1048_s6 = scalar_select %p895_p13, 1, 0 }
  0x3a   : > { %p494_p1 = pneg %p895_p13  ;;  %p603_p3 = scmp.ne.s32.totalorder %s904_s11, %s602_s22 }
  0x3b   : > { %s607_s7 = scalar_lea.hbm %s1035_s2, 256  ;;  %p608_p5 = scmp.lt.u32.totalorder %s904_s11, %s1035_s2 }
  0x3c   : > { %p913_p0 = pnand %p494_p1, %p1037_p11  ;;  %p605_p2 = pnand %p603_p3, %p574_p9 }
  0x3d   : > { %p609_p12 = scmp.lt.u32.totalorder %s607_s7, %s602_s22  ;;  %p611_p11 = scmp.lt.u32.totalorder %s602_s22, %s904_s11 }
  0x3e   : > { %s1049_s21 = scalar_select %p913_p0, 1, 0 }
  0x3f   : > { %p606_p4 = pneg %p605_p2  ;;  %p610_p1 = por %p609_p12, %p608_p5 }
  0x41   : > { %p612_p10 = por %p611_p11, %p610_p1 }
  0x43   : > { %p613_p8 = pnand %p612_p10, %p606_p4 }
  0x45   : > { %616 = shalt.err (!%p613_p8)
}
  0x46   : > { %s617_s25 = scalar_lea.vmem %s207_s20, 128  ;;  %s750_s19 = smov [#allocation7]  }
  0x47   : > { %p618_p6 = scmp.ne.s32.totalorder %s207_s20, %s617_s25  ;;  %s622_s23 = sshll.u32 %s750_s19, 4  ;;  %s623_s23 = int_to_ptr.vmem [resolvable:$false] %s622_s23 }
  0x48   : > { %s624_s27 = scalar_lea.vmem %s623_s23, 256  ;;  %p625_p13 = scmp.lt.s32.totalorder %s207_s20, %s623_s23 }
  0x49   : > { %p620_p3 = pnand %p618_p6, %p574_p9  ;;  %p626_p0 = scmp.lt.s32.totalorder %s624_s27, %s617_s25 }
  0x4b   : > { %p621_p2 = pneg %p620_p3  ;;  %p627_p5 = por %p626_p0, %p625_p13 }
  0x4d   : > { %p628_p12 = pnand %p627_p5, %p621_p2 }
  0x4f   : > { %631 = shalt.err (!%p628_p12)
}
  0x50   : > { %504 = dma.hbm_to_vmem [thread:$0]  (!%p833_p7), %s904_s11, 128, %s207_s20, %s840_s5  }
  0x51   : > { %s632_s9 = scalar_lea.hbm %s1033_s0, 256  ;;  %p1050_p11 = scmp.ne.s32.totalorder %s1049_s21, 0 }
  0x52   : > { %p633_p9 = scmp.ne.s32.totalorder %s1033_s0, %s632_s9  ;;  %p639_p13 = scmp.lt.u32.totalorder %s632_s9, %s1033_s0 }
  0x53   : > { %p634_p6 = pneg %p1050_p11 }
  0x55   : > { %p635_p8 = pnand %p634_p6, %p633_p9 }
  0x57   : > { %p636_p10 = pneg %p635_p8 }
  0x59   : > { %p641_p0 = pnand %p639_p13, %p636_p10 }
  0x5b   : > { %644 = shalt.err (!%p641_p0)
}
  0x5c   : > { %s645_s29 = scalar_lea.vmem %s906_s8, 256  ;;  %p653_p3 = scmp.lt.s32.totalorder %s906_s8, %s906_s8 }
  0x5d   : > { %p646_p7 = scmp.ne.s32.totalorder %s906_s8, %s645_s29  ;;  %p654_p2 = scmp.lt.s32.totalorder %s645_s29, %s645_s29 }
  0x5f   : > { %p648_p4 = pnand %p646_p7, %p634_p6  ;;  %p655_p5 = por %p654_p2, %p653_p3 }
  0x61   : > { %p649_p1 = pneg %p648_p4 }
  0x63   : > { %p656_p12 = pnand %p655_p5, %p649_p1 }
  0x65   : > { %659 = shalt.err (!%p656_p12)
}
  0x66   : > { %s751_s1 = smov 128   ;;  %s752_s5 = smov 8  }
  0x67   : > { %497 = dma.hbm_to_vmem [thread:$0]  (!%p1050_p11), %s1033_s0, 256, %s906_s8, [#allocation3], %s751_s1, %s751_s1, %s752_s5  }
  0x68   : > { %p1051_p9 = scmp.ne.s32.totalorder %s1048_s6, 0 }
  0x69   : > { %p1052_p6 = scmp.eq.s32.totalorder (!%p1051_p9), %s869_s26, 0 }
  0x6a   : > { %215 = sbr.rel (%p1051_p9) target bundleno = 183 (0xb7), region = 32 }
  0x71   : > { %713 = dma.done.wait (%p1052_p6), [#allocation3], 256   ;;  %p1053_p8 = pmov %p1052_p6 }
  0x72   : > { %s221_s23 = sand.u32 1, %s869_s26   ;;  %s223_s27 = sand.u32 1, %s730_s13  }
  0x73   : > { %715 = vsyncadd (%p1053_p8), [#allocation3], 4294967040  ;;  %s968_s21 = sshll.u32 %s223_s27, 3  ;;  %s222_s8 = scalar_lea.sflag [#allocation6], %s221_s23 }
  0x74   : > { %s225_s22 = scalar_lea.vmem [#allocation5], %s968_s21  ;;  %p1054_p11 = scmp.ne.s32.totalorder %s1045_s30, 0 }
  0x76   : > { %717 = dma.done.wait (%p1054_p11), %s222_s8, 256  }
  0x77   : > { %719 = vsyncadd (%p1054_p11), %s222_s8, 4294967040  ;;  %v266_v0 = vlaneseq  ;;  %v262_v6 = vld [vmem:[#allocation2] sm:$0xff]  ;;  %s234_s26 = scalar_lea.vmem [#allocation7], %s968_s21  ;;  %v263_v23 = vld [vmem:[#allocation2 + $0x8] sm:$0x3]  ;;  %s261_s30 = scalar_lea.vmem [#allocation8], %s968_s21 }
  0x78   : > { %v264_v7 = vld [vmem:[%s234_s26] sm:$0xff]  ;;  %v265_v40 = vld [vmem:[%s225_s22] sm:$0xff]  ;;  %s349_s6 = sshll.u32 %s261_s30, 4  ;;  %s481_s7 = sshll.u32 %s738_s15, 7  ;;  %s980_s6 = int_to_ptr.vmem [resolvable:$true] %s349_s6 }
  0x79   : > { %v267_v1 = vshrl.u32 %v266_v0, 7  ;;  %s985_s25 = scalar_lea.hbm %s1036_s3, %s481_s7  ;;  %s335_s19 = scalar_lea.sflag [#allocation4], %s223_s27 }
  0x7a   : > { %s660_s29 = scalar_lea.vmem %s980_s6, 128  ;;  %p1055_p13 = scmp.ne.s32.totalorder %s1046_s28, 0 }
  0x7b   : > { %v268_v2 = vsub.s32 1, %v267_v1  ;;  %v273_v3 = vsub.s32 2, %v267_v1  ;;  %v300_v4 = vsub.s32 6, %v267_v1  ;;  %v305_v5 = vsub.s32 7, %v267_v1  ;;  %p661_p10 = scmp.ne.s32.totalorder %s980_s6, %s660_s29  ;;  %s753_s15 = smov [#allocation8]  }
  0x7c   : > { %v289_v22 = vsub.s32 3, %v267_v1  ;;  %v284_v24 = vsub.s32 0, %v267_v1  ;;  %v316_v25 = vsub.s32 5, %v267_v1  ;;  %v295_v29 = vsub.s32 4, %v267_v1  ;;  %s664_s1 = sshll.u32 %s753_s15, 4  ;;  %s665_s1 = int_to_ptr.vmem [resolvable:$false] %s664_s1 }
  0x7d   : > { %v269_v8 = vrot.slane %v262_v6, %v268_v2  ;;  %v274_v9 = vrot.slane %v262_v6, %v273_v3  ;;  %v301_v10 = vrot.slane %v262_v6, %v300_v4  ;;  %v306_v11 = vrot.slane %v262_v6, %v305_v5  ;;  %p662_p0 = pnand %p661_p10, %p1055_p13  ;;  %s666_s5 = scalar_lea.vmem %s665_s1, 256 }
  0x7e   : > { %v290_v26 = vrot.slane %v262_v6, %v289_v22  ;;  %v322_v27 = vrot.slane %v263_v23, %v284_v24  ;;  %v285_v28 = vrot.slane %v262_v6, %v284_v24  ;;  %v317_v30 = vrot.slane %v262_v6, %v316_v25  ;;  %p667_p4 = scmp.lt.s32.totalorder %s980_s6, %s665_s1  ;;  %p668_p1 = scmp.lt.s32.totalorder %s666_s5, %s660_s29 }
  0x7f   : > { %v270_v12 = vmul.f32 %v269_v8, %v264_v7  ;;  %v302_v13 = vmul.f32 %v301_v10, %v264_v7  ;;  %v296_v36 = vrot.slane %v262_v6, %v295_v29  ;;  %v328_v38 = vrot.slane %v263_v23, %v268_v2  ;;  %p663_p7 = pneg %p662_p0 }
  0x80   : > { %v291_v31 = vmul.f32 %v290_v26, %v264_v7  ;;  %v323_v33 = vmul.f32 %v322_v27, %v264_v7  ;;  %p669_p3 = por %p668_p1, %p667_p4 }
  0x81   : > { %v275_v14 = vadd.f32 %v274_v9, %v270_v12  ;;  %v307_v15 = vadd.f32 %v306_v11, %v302_v13 }
  0x82   : > { %p670_p2 = pnand %p669_p3, %p663_p7 }
  0x83   : > { %v478_v16 = vmul.f32 -1.442695, %v275_v14  ;;  %v479_v17 = vmul.f32 -1.442695, %v307_v15 }
  0x85   : > { %564 = vpow2.f32 %v478_v16 }
  0x86   : > { %566 = vpow2.f32 %v479_v17 }
  0x8f   : > { %v565_v18 = vpop.eup %564 }
  0x90   : > { %v567_v19 = vpop.eup %566  ;;  %v279_v20 = vadd.f32 1.0, %v565_v18 }
  0x91   : > { %v311_v21 = vadd.f32 1.0, %v567_v19 }
  0x92   : > { %568 = vrcp.f32 %v279_v20 }
  0x93   : > { %570 = vrcp.f32 %v311_v21 }
  0x9c   : > { %v569_v32 = vpop.eup %568 }
  0x9d   : > { %v571_v34 = vpop.eup %570  ;;  %v286_v35 = vmul.f32 %v569_v32, %v285_v28 }
  0x9e   : > { %v318_v37 = vmul.f32 %v571_v34, %v317_v30 }
  0x9f   : > { %v292_v39 = vadd.f32 %v291_v31, %v286_v35 }
  0xa0   : > { %v324_v41 = vadd.f32 %v323_v33, %v318_v37 }
  0xa1   : > { %v297_v42 = vadd.f32 %v296_v36, %v292_v39 }
  0xa2   : > { %v329_v43 = vadd.f32 %v328_v38, %v324_v41 }
  0xa3   : > { %v330_v44 = vsub.f32 %v265_v40, %v297_v42 }
  0xa5   : > { %v331_v45 = vmul.f32 %v330_v44, %v329_v43 }
  0xa7   : > { %v332_v46 = vadd.f32 %v331_v45, %v297_v42 }
  0xa9   : > { %333 = vst [vmem:[%s261_s30] sm:$0xff] %v332_v46 }
  0xaa   : > { %673 = shalt.err (!%p670_p2)
}
  0xab   : > { %s674_s11 = scalar_lea.hbm %s985_s25, 128  ;;  %s678_s27 = scalar_lea.hbm %s1036_s3, 256 }
  0xac   : > { %p675_p5 = scmp.ne.s32.totalorder %s985_s25, %s674_s11  ;;  %p679_p6 = scmp.lt.u32.totalorder %s985_s25, %s1036_s3 }
  0xad   : > { %p680_p8 = scmp.lt.u32.totalorder %s678_s27, %s674_s11  ;;  %p682_p10 = scmp.lt.u32.totalorder %s674_s11, %s985_s25 }
  0xae   : > { %p676_p12 = pnand %p675_p5, %p1055_p13 }
  0xaf   : > { %p681_p11 = por %p680_p8, %p679_p6 }
  0xb0   : > { %p677_p9 = pneg %p676_p12 }
  0xb1   : > { %p683_p0 = por %p682_p10, %p681_p11 }
  0xb3   : > { %p684_p7 = pnand %p683_p0, %p677_p9 }
  0xb5   : > { %687 = shalt.err (!%p684_p7)
}
  0xb6   : > { %492 = dma.vmem_to_hbm [thread:$0]  (%p1055_p13), %s980_s6, 128, %s985_s25, %s335_s19  }
  0xb7 PF: > { %s361_s22 = sand.u32 1, %s726_s12   ;;  %p1056_p4 = scmp.ne.s32.totalorder %s1047_s4, 0 }
  0xb8   : > { %p1057_p1 = scmp.ge.s32.totalorder %s746_s17, 2  ;;  %s362_s26 = scalar_lea.sflag [#allocation4], %s361_s22 }
  0xba   : > { %p506_p3 = pnand %p1057_p1, %p1056_p4 }
  0xbc   : > { %721 = dma.done.wait (!%p506_p3), %s362_s26, 128  }
  0xbd   : > { %723 = vsyncadd (!%p506_p3), %s362_s26, 4294967168  ;;  %s20_s17 = sadd.s32 1, %s746_s17   ;;  %s1058_s12 = smov %s730_s13 }
  0xbe   : > { %p17_p2 = scmp.ge.s32.totalorder %s20_s17, 4   ;;  %s1059_s13 = smov %s734_s14 }
  0xbf   : > { %s1060_s14 = smov %s822_s24  ;;  %s1061_s15 = smov %s742_s16 }
  0xc0   : > { %s1062_s16 = smov %s1064_s18  ;;  %19 = sbr.rel (!%p17_p2) target bundleno = 9 (0x9), region = 94 }
  0xc7   :  { %367 = vsyncpa [#allocation3], 1 }
  0xc8   :  { %369 = vsyncpa [#allocation3 + $0x1], 1 }
  0xc9   :  { %370 = vsyncpa [#allocation6], 1 }
  0xca   :  { %372 = vsyncpa [#allocation6 + $0x1], 1 }
  0xcb   :  { %373 = vsyncpa [#allocation4], 1 }
  0xcc   :  { %375 = vsyncpa [#allocation4 + $0x1], 1 }

</bundles_post_ra>
